<compile_context>
chip_gen: v5e
topology: v5e:2x2
jax: 0.10.0
libtpu: 0.0.40
codegen_flags: <defaults>
</compile_context>

<pallas_src>
import jax
import jax.numpy as jnp
from jax import lax
from jax.experimental import pallas as pl
from jax.experimental.pallas import tpu as pltpu

LN_EPS = 1e-5          # torch.nn.LayerNorm default
LEAKY_SLOPE = 0.01     # torch.nn.LeakyReLU default


def _ln_leaky(h, gamma, beta):
    """Fused single-pass LayerNorm over the feature axis (axis 0) + LeakyReLU.

    h: (H, tb) f32; gamma/beta: (H, 1).  Uses E[h^2] - mu^2 (clamped) so only
    two feature-axis reductions are issued per LayerNorm.
    """
    inv_h = 1.0 / h.shape[0]
    s1 = jnp.sum(h, axis=0, keepdims=True)             # (1, tb)
    s2 = jnp.sum(h * h, axis=0, keepdims=True)         # (1, tb)
    mu = s1 * inv_h
    var = jnp.maximum(s2 * inv_h - mu * mu, 0.0)
    hn = (h - mu) * lax.rsqrt(var + LN_EPS) * gamma + beta
    # LeakyReLU with slope < 1  ==  max(x, slope*x): one VALU op per element.
    return jnp.maximum(hn, LEAKY_SLOPE * hn)


def critic_kernel(x_ref, w1_ref, w2_ref, p_ref, b3_ref, o_ref):
    # x tile in its native (tb, S) layout (contiguous HBM rows, dense DMA).
    x = x_ref[...].astype(jnp.bfloat16)                 # (tb, S) -> bf16 for MXU

    p = p_ref[...]                                      # (H, 8) packed columns
    b1, g1, be1 = p[:, 0:1], p[:, 1:2], p[:, 2:3]
    b2, g2, be2 = p[:, 3:4], p[:, 4:5], p[:, 5:6]
    w3 = p[:, 6:7]

    # Layer 1: W1 (H,S) contracted with x (tb,S) over S -> feature-major (H,tb)
    # (no physical transpose of x; the small operand transpose rides in the
    # MXU/XLU slack).  bf16 operands, f32 accumulation.
    h = lax.dot_general(w1_ref[...], x,
                        dimension_numbers=(((1,), (1,)), ((), ())),
                        preferred_element_type=jnp.float32) + b1
    h = _ln_leaky(h, g1, be1)

    # Layer 2: W2 (H,H) @ h (H,tb) -> (H,tb); bf16 operands, f32 accumulation.
    h = jnp.dot(w2_ref[...], h.astype(jnp.bfloat16),
                preferred_element_type=jnp.float32) + b2
    h = _ln_leaky(h, g2, be2)

    # Value head: VPU multiply + feature-axis sum (avoids a 1-column MXU
    # matmul); b3 is a scalar read from SMEM.
    v = jnp.sum(h * w3, axis=0, keepdims=True) + b3_ref[0]
    o_ref[...] = v.astype(o_ref.dtype)                  # (1, tb) lane-dense store


def _pick_batch_tile(B, *, min_steps=4):
    """Largest lane-dense tile (multiple of 128, capped at 1024) that keeps the
    grid at >= min_steps (>= 2 per v7x TensorCore, with pipelining room);
    falls back to >= 2 steps, then the full batch."""
    for steps in (min_steps, 2):
        for tb in (1024, 512, 256, 128):
            if B % tb == 0 and B // tb >= steps:
                return tb
    return B


def model_critic_forward(x, params, *, batch_tile=None):
    """x: (B, state_size) float32 -> (B, 1) float32."""
    B, S = x.shape
    H = params["w1"].shape[0]

    tb = _pick_batch_tile(B) if batch_tile is None else batch_tile
    assert B % tb == 0, "batch must be divisible by batch_tile"
    assert tb == B or tb % 128 == 0, (
        "batch_tile must equal the full batch or be a multiple of 128 (lane "
        "width) to satisfy the (8, 128) BlockSpec constraint")

    # Weights shipped as bf16 (halves their HBM stream; matmul accumulates f32).
    w1 = params["w1"].astype(jnp.bfloat16)              # (H, S)
    w2 = params["w2"].astype(jnp.bfloat16)              # (H, H)
    packed = params["packed"]                           # (H, 8) f32
    b3 = params["b3"]                                   # (1,)  f32 -> SMEM

    full = lambda shape: pl.BlockSpec(shape, lambda i: (0,) * len(shape))
    smem = pl.BlockSpec(memory_space=pltpu.MemorySpace.SMEM)

    grid_spec = pltpu.PrefetchScalarGridSpec(
        num_scalar_prefetch=0,
        grid=(B // tb,),
        in_specs=[
            pl.BlockSpec((tb, S), lambda i: (i, 0)),    # x tile, native layout
            full((H, S)),                               # w1 (bf16)
            full((H, H)),                               # w2 (bf16)
            full((H, 8)),                               # packed b/gamma/beta/w3
            smem,                                       # b3 scalar -> SMEM
        ],
        out_specs=pl.BlockSpec((1, tb), lambda i: (0, i)),
    )

    flops = 2 * B * (S * H + H * H + H)
    bytes_accessed = (4 * B * S            # x (f32)
                      + 2 * (S * H + H * H)  # bf16 weights
                      + 4 * H * 8 + 4        # packed params + b3
                      + 4 * B)               # output
    cost = pl.CostEstimate(flops=flops, transcendentals=2 * B,
                           bytes_accessed=bytes_accessed)

    out = pl.pallas_call(
        critic_kernel,
        out_shape=jax.ShapeDtypeStruct((1, B), jnp.float32),
        grid_spec=grid_spec,
        compiler_params=pltpu.CompilerParams(
            dimension_semantics=("parallel",)),         # megacore sharding on v7x
        cost_estimate=cost,
    )(x, w1, w2, packed, b3)

    return out.T                                        # (B, 1): tiny, cheap


def init_params(key, state_size, hidden_size):
    """PyTorch-default init.  Weights in PyTorch layout W[out, in]; the seven
    per-feature parameter columns are also packed into one (H, 8) array."""
    k1, k2, k3, k4, k5, k6 = jax.random.split(key, 6)

    def lin(kw, kb, fan_in, fan_out):
        bound = 1.0 / (fan_in ** 0.5)
        w = jax.random.uniform(kw, (fan_out, fan_in), jnp.float32, -bound, bound)
        b = jax.random.uniform(kb, (fan_out,), jnp.float32, -bound, bound)
        return w, b

    w1, b1 = lin(k1, k2, state_size, hidden_size)
    w2, b2 = lin(k3, k4, hidden_size, hidden_size)
    w3, b3 = lin(k5, k6, hidden_size, 1)                # w3: (1, H), b3: (1,)
    g = jnp.ones((hidden_size,), jnp.float32)
    be = jnp.zeros((hidden_size,), jnp.float32)
    # Columns: b1, g1, be1, b2, g2, be2, w3, pad  -> (H, 8)
    packed = jnp.stack([b1, g, be, b2, g, be, w3[0], be], axis=1)
    return dict(w1=w1, b1=b1, g1=g, be1=be,
                w2=w2, b2=b2, g2=g, be2=be,
                w3=w3, b3=b3, packed=packed)


def _reference(x, p, *, bf16_matmuls=True):
    """Pure-JAX batch-major reference (matches the PyTorch module).  With
    bf16_matmuls=True it mirrors the kernel's bf16 MXU operands."""
    cast = (lambda a: a.astype(jnp.bfloat16)) if bf16_matmuls else (lambda a: a)

    def ln(h, g, b):
        mu = jnp.mean(h, axis=-1, keepdims=True)
        var = jnp.mean((h - mu) ** 2, axis=-1, keepdims=True)
        return (h - mu) * lax.rsqrt(var + LN_EPS) * g + b

    def lrelu(h):
        return jnp.where(h >= 0, h, LEAKY_SLOPE * h)

    h = jnp.dot(cast(x), cast(p["w1"]).T,
                preferred_element_type=jnp.float32) + p["b1"]
    h = lrelu(ln(h, p["g1"], p["be1"]))
    h = jnp.dot(cast(h), cast(p["w2"]).T,
                preferred_element_type=jnp.float32) + p["b2"]
    h = lrelu(ln(h, p["g2"], p["be2"]))
    return jnp.dot(h, p["w3"].T) + p["b3"]              # (B, 1)


if __name__ == "__main__":
    # hidden=32 per the module's spirit; batch=512 -> tb=128, grid=(4,):
    # pipelined x DMAs and >= 2 grid steps per v7x TensorCore.
    state_size, hidden_size, batch = 16, 32, 512

    key = jax.random.PRNGKey(0)
    kx, kp = jax.random.split(key)
    x = jax.random.normal(kx, (batch, state_size), dtype=jnp.float32)
    params = init_params(kp, state_size, hidden_size)

    out = jax.block_until_ready(model_critic_forward(x, params))
    assert out.shape == (batch, 1)

    ref_bf16 = _reference(x, params, bf16_matmuls=True)   # mirrors kernel precision
    ref_f32 = _reference(x, params, bf16_matmuls=False)   # exact module semantics
    assert jnp.allclose(out, ref_bf16, atol=2e-3, rtol=2e-3), "mismatch vs bf16 reference"
    assert jnp.allclose(out, ref_f32, atol=5e-2, rtol=5e-2), "mismatch vs f32 reference"

    print("KERNEL_OK")
</pallas_src>

<mosaic_0001>
module attributes {stable_mosaic.version = 11 : i64} {
  func.func @critic_kernel(%arg0: i32, %arg1: memref<128x16xf32, #tpu.memory_space<vmem>>, %arg2: memref<32x16xbf16, #tpu.memory_space<vmem>>, %arg3: memref<32x32xbf16, #tpu.memory_space<vmem>>, %arg4: memref<32x8xf32, #tpu.memory_space<vmem>>, %arg5: memref<1xf32, #tpu.memory_space<smem>>, %arg6: memref<1x128xf32, #tpu.memory_space<vmem>>) attributes {dimension_semantics = [#tpu.dimension_semantics<parallel>], iteration_bounds = array<i64: 4>, scalar_prefetch = 0 : i64, scratch_operands = 0 : i64, tpu.core_type = #tpu.core_type<tc>, window_params = [{transform_indices = @transform_0, window_bounds = array<i64: 128, 16>}, {pipeline_mode = #tpu.pipeline_mode<synchronous>, transform_indices = @transform_1, window_bounds = array<i64: 32, 16>}, {pipeline_mode = #tpu.pipeline_mode<synchronous>, transform_indices = @transform_2, window_bounds = array<i64: 32, 32>}, {pipeline_mode = #tpu.pipeline_mode<synchronous>, transform_indices = @transform_3, window_bounds = array<i64: 32, 8>}, {transform_indices = @transform_4, window_bounds = array<i64: 1>}, {transform_indices = @transform_5, window_bounds = array<i64: 1, 128>}]} {
    %c0 = arith.constant 0 : index
    %c0_0 = arith.constant 0 : index
    %0 = vector.load %arg1[%c0, %c0_0] : memref<128x16xf32, #tpu.memory_space<vmem>>, vector<128x16xf32>
    %1 = arith.truncf %0 : vector<128x16xf32> to vector<128x16xbf16>
    %c0_1 = arith.constant 0 : index
    %c0_2 = arith.constant 0 : index
    %2 = vector.load %arg4[%c0_1, %c0_2] : memref<32x8xf32, #tpu.memory_space<vmem>>, vector<32x8xf32>
    %3 = vector.extract_strided_slice %2 {offsets = [0, 0], sizes = [32, 1], strides = [1, 1]} : vector<32x8xf32> to vector<32x1xf32>
    %4 = vector.extract_strided_slice %2 {offsets = [0, 1], sizes = [32, 1], strides = [1, 1]} : vector<32x8xf32> to vector<32x1xf32>
    %5 = vector.extract_strided_slice %2 {offsets = [0, 2], sizes = [32, 1], strides = [1, 1]} : vector<32x8xf32> to vector<32x1xf32>
    %6 = vector.extract_strided_slice %2 {offsets = [0, 3], sizes = [32, 1], strides = [1, 1]} : vector<32x8xf32> to vector<32x1xf32>
    %7 = vector.extract_strided_slice %2 {offsets = [0, 4], sizes = [32, 1], strides = [1, 1]} : vector<32x8xf32> to vector<32x1xf32>
    %8 = vector.extract_strided_slice %2 {offsets = [0, 5], sizes = [32, 1], strides = [1, 1]} : vector<32x8xf32> to vector<32x1xf32>
    %9 = vector.extract_strided_slice %2 {offsets = [0, 6], sizes = [32, 1], strides = [1, 1]} : vector<32x8xf32> to vector<32x1xf32>
    %c0_3 = arith.constant 0 : index
    %c0_4 = arith.constant 0 : index
    %10 = vector.load %arg2[%c0_3, %c0_4] : memref<32x16xbf16, #tpu.memory_space<vmem>>, vector<32x16xbf16>
    %cst = arith.constant dense<0.000000e+00> : vector<32x128xf32>
    %11 = tpu.matmul %10, %1, %cst {dimension_numbers = #tpu.dot_dimension_numbers<[1], [1], [0], [0], [0, 0, 1, 0], [], []>} : vector<32x16xbf16>, vector<128x16xbf16>, vector<32x128xf32> -> vector<32x128xf32>
    %12 = vector.broadcast %3 : vector<32x1xf32> to vector<32x128xf32>
    %13 = arith.addf %11, %12 : vector<32x128xf32>
    %cst_5 = arith.constant dense<0.000000e+00> : vector<128xf32>
    %14 = vector.multi_reduction <add>, %13, %cst_5 [0] : vector<32x128xf32> to vector<128xf32>
    %15 = vector.shape_cast %14 : vector<128xf32> to vector<1x128xf32>
    %16 = arith.mulf %13, %13 : vector<32x128xf32>
    %cst_6 = arith.constant dense<0.000000e+00> : vector<128xf32>
    %17 = vector.multi_reduction <add>, %16, %cst_6 [0] : vector<32x128xf32> to vector<128xf32>
    %18 = vector.shape_cast %17 : vector<128xf32> to vector<1x128xf32>
    %cst_7 = arith.constant 3.125000e-02 : f32
    %19 = vector.broadcast %cst_7 : f32 to vector<1x128xf32>
    %20 = arith.mulf %15, %19 : vector<1x128xf32>
    %cst_8 = arith.constant 3.125000e-02 : f32
    %21 = vector.broadcast %cst_8 : f32 to vector<1x128xf32>
    %22 = arith.mulf %18, %21 : vector<1x128xf32>
    %23 = arith.mulf %20, %20 : vector<1x128xf32>
    %24 = arith.subf %22, %23 : vector<1x128xf32>
    %cst_9 = arith.constant 0.000000e+00 : f32
    %25 = vector.broadcast %cst_9 : f32 to vector<1x128xf32>
    %26 = arith.maximumf %24, %25 : vector<1x128xf32>
    %27 = vector.broadcast %20 : vector<1x128xf32> to vector<32x128xf32>
    %28 = arith.subf %13, %27 : vector<32x128xf32>
    %cst_10 = arith.constant 9.99999974E-6 : f32
    %29 = vector.broadcast %cst_10 : f32 to vector<1x128xf32>
    %30 = arith.addf %26, %29 : vector<1x128xf32>
    %31 = math.rsqrt %30 : vector<1x128xf32>
    %32 = vector.broadcast %31 : vector<1x128xf32> to vector<32x128xf32>
    %33 = arith.mulf %28, %32 : vector<32x128xf32>
    %34 = vector.broadcast %4 : vector<32x1xf32> to vector<32x128xf32>
    %35 = arith.mulf %33, %34 : vector<32x128xf32>
    %36 = vector.broadcast %5 : vector<32x1xf32> to vector<32x128xf32>
    %37 = arith.addf %35, %36 : vector<32x128xf32>
    %cst_11 = arith.constant 0.00999999977 : f32
    %38 = vector.broadcast %cst_11 : f32 to vector<32x128xf32>
    %39 = arith.mulf %38, %37 : vector<32x128xf32>
    %40 = arith.maximumf %37, %39 : vector<32x128xf32>
    %c0_12 = arith.constant 0 : index
    %c0_13 = arith.constant 0 : index
    %41 = vector.load %arg3[%c0_12, %c0_13] : memref<32x32xbf16, #tpu.memory_space<vmem>>, vector<32x32xbf16>
    %42 = arith.truncf %40 : vector<32x128xf32> to vector<32x128xbf16>
    %cst_14 = arith.constant dense<0.000000e+00> : vector<32x128xf32>
    %43 = tpu.matmul %41, %42, %cst_14 {dimension_numbers = #tpu.dot_dimension_numbers<[1], [0], [0], [1], [0, 0, 1, 1], [], []>} : vector<32x32xbf16>, vector<32x128xbf16>, vector<32x128xf32> -> vector<32x128xf32>
    %44 = vector.broadcast %6 : vector<32x1xf32> to vector<32x128xf32>
    %45 = arith.addf %43, %44 : vector<32x128xf32>
    %cst_15 = arith.constant dense<0.000000e+00> : vector<128xf32>
    %46 = vector.multi_reduction <add>, %45, %cst_15 [0] : vector<32x128xf32> to vector<128xf32>
    %47 = vector.shape_cast %46 : vector<128xf32> to vector<1x128xf32>
    %48 = arith.mulf %45, %45 : vector<32x128xf32>
    %cst_16 = arith.constant dense<0.000000e+00> : vector<128xf32>
    %49 = vector.multi_reduction <add>, %48, %cst_16 [0] : vector<32x128xf32> to vector<128xf32>
    %50 = vector.shape_cast %49 : vector<128xf32> to vector<1x128xf32>
    %cst_17 = arith.constant 3.125000e-02 : f32
    %51 = vector.broadcast %cst_17 : f32 to vector<1x128xf32>
    %52 = arith.mulf %47, %51 : vector<1x128xf32>
    %cst_18 = arith.constant 3.125000e-02 : f32
    %53 = vector.broadcast %cst_18 : f32 to vector<1x128xf32>
    %54 = arith.mulf %50, %53 : vector<1x128xf32>
    %55 = arith.mulf %52, %52 : vector<1x128xf32>
    %56 = arith.subf %54, %55 : vector<1x128xf32>
    %cst_19 = arith.constant 0.000000e+00 : f32
    %57 = vector.broadcast %cst_19 : f32 to vector<1x128xf32>
    %58 = arith.maximumf %56, %57 : vector<1x128xf32>
    %59 = vector.broadcast %52 : vector<1x128xf32> to vector<32x128xf32>
    %60 = arith.subf %45, %59 : vector<32x128xf32>
    %cst_20 = arith.constant 9.99999974E-6 : f32
    %61 = vector.broadcast %cst_20 : f32 to vector<1x128xf32>
    %62 = arith.addf %58, %61 : vector<1x128xf32>
    %63 = math.rsqrt %62 : vector<1x128xf32>
    %64 = vector.broadcast %63 : vector<1x128xf32> to vector<32x128xf32>
    %65 = arith.mulf %60, %64 : vector<32x128xf32>
    %66 = vector.broadcast %7 : vector<32x1xf32> to vector<32x128xf32>
    %67 = arith.mulf %65, %66 : vector<32x128xf32>
    %68 = vector.broadcast %8 : vector<32x1xf32> to vector<32x128xf32>
    %69 = arith.addf %67, %68 : vector<32x128xf32>
    %cst_21 = arith.constant 0.00999999977 : f32
    %70 = vector.broadcast %cst_21 : f32 to vector<32x128xf32>
    %71 = arith.mulf %70, %69 : vector<32x128xf32>
    %72 = arith.maximumf %69, %71 : vector<32x128xf32>
    %73 = vector.broadcast %9 : vector<32x1xf32> to vector<32x128xf32>
    %74 = arith.mulf %72, %73 : vector<32x128xf32>
    %cst_22 = arith.constant dense<0.000000e+00> : vector<128xf32>
    %75 = vector.multi_reduction <add>, %74, %cst_22 [0] : vector<32x128xf32> to vector<128xf32>
    %76 = vector.shape_cast %75 : vector<128xf32> to vector<1x128xf32>
    %c0_23 = arith.constant 0 : index
    %77 = memref.load %arg5[%c0_23] : memref<1xf32, #tpu.memory_space<smem>>
    %78 = vector.broadcast %77 : f32 to vector<1x128xf32>
    %79 = arith.addf %76, %78 : vector<1x128xf32>
    %c0_24 = arith.constant 0 : index
    %c0_25 = arith.constant 0 : index
    %80 = vector.load %arg6[%c0_24, %c0_25] : memref<1x128xf32, #tpu.memory_space<vmem>>, vector<1x128xf32>
    tpu.vector_store %arg6[%c0_24, %c0_25], %79 {strides = array<i32>} : memref<1x128xf32, #tpu.memory_space<vmem>>, vector<1x128xf32>,
    return
  }
  func.func @transform_0(%arg0: i32) -> (i32, i32) {
    %c0_i32 = arith.constant 0 : i32
    %c0_i32_0 = arith.constant 0 : i32
    return %arg0, %c0_i32 : i32, i32
  }
  func.func @transform_1(%arg0: i32) -> (i32, i32) {
    %c0_i32 = arith.constant 0 : i32
    %c0_i32_0 = arith.constant 0 : i32
    %c0_i32_1 = arith.constant 0 : i32
    return %c0_i32, %c0_i32_0 : i32, i32
  }
  func.func @transform_2(%arg0: i32) -> (i32, i32) {
    %c0_i32 = arith.constant 0 : i32
    %c0_i32_0 = arith.constant 0 : i32
    %c0_i32_1 = arith.constant 0 : i32
    return %c0_i32, %c0_i32_0 : i32, i32
  }
  func.func @transform_3(%arg0: i32) -> (i32, i32) {
    %c0_i32 = arith.constant 0 : i32
    %c0_i32_0 = arith.constant 0 : i32
    %c0_i32_1 = arith.constant 0 : i32
    return %c0_i32, %c0_i32_0 : i32, i32
  }
  func.func @transform_4(%arg0: i32) -> i32 {
    %c0_i32 = arith.constant 0 : i32
    %c0_i32_0 = arith.constant 0 : i32
    return %c0_i32 : i32
  }
  func.func @transform_5(%arg0: i32) -> (i32, i32) {
    %c0_i32 = arith.constant 0 : i32
    %c0_i32_0 = arith.constant 0 : i32
    return %c0_i32, %arg0 : i32, i32
  }
}

</mosaic_0001>

<bundles_post_ra>
// kernel: tpu_custom_call.1
= control target key start
LH: loop header
LB: loop body
LE: loop exit
PB: predicated region body
PF: predicated region fallthrough
CT: control target
= control target key end

     0   :  { %s1081_s0 = inlined_call_operand.vmem [shape: f32[512,16], index: 0, kind: input, shape index: {}]   ;;  %s1082_s1 = inlined_call_operand.vmem [shape: bf16[32,16], index: 1, kind: input, shape index: {}]   ;;  %s1083_s2 = inlined_call_operand.vmem [shape: bf16[32,32], index: 2, kind: input, shape index: {}]   ;;  %s1084_s3 = inlined_call_operand.vmem [shape: f32[32,8], index: 3, kind: input, shape index: {}]   ;;  %s1085_s4 = inlined_call_operand.<no memory space> [shape: f32[1], index: 4, kind: input, shape index: {}]   ;;  %s1086_s5 = inlined_call_operand.hbm [shape: f32[1,512], index: 5, kind: output, shape index: {}]  }
   0x1   :  { %10 = sst [smem:[#allocation2]] %s1085_s4 }
   0x2   :  { %11 = vsyncpa [#allocation4], 0 }
   0x3   :  { %13 = vsyncpa [#allocation4 + $0x1], 0  ;;  %s897_s20 = smov 0   ;;  %s899_s21 = smov 0  }
   0x4   :  { %s901_s22 = smov 0   ;;  %s903_s23 = smov 0  }
   0x5 LB: > { %s918_s4 = sadd.s32 4294967295, %s855_s23   ;;  %s685_s24 = sadd.s32 4294967294, %s855_s23   ;;  %s855_s23 = sphi %s903_s23, %s1092_s23   ;;  %s851_s22 = sphi %s901_s22, %s1091_s22   ;;  %s847_s21 = sphi %s899_s21, %s1090_s21   ;;  %s843_s20 = sphi %s897_s20, %s1089_s20  }
   0x6   : > { %s922_s25 = sadd.s32 1, %s855_s23   ;;  %s136_s26 = sadd.s32 1, %s851_s22 }
   0x7   : > { %s133_s27 = ssub.s32 %s855_s23, %s922_s25  ;;  %p146_p0 = scmp.ne.s32.totalorder %s851_s22, %s847_s21 }
   0x8   : > { %p134_p1 = scmp.eq.s32.totalorder %s133_s27, 0  ;;  %p147_p2 = scmp.eq.s32.totalorder %s918_s4, 3 }
   0x9   : > { %p152_p3 = scmp.ne.s32.totalorder %s847_s21, %s843_s20  ;;  %p153_p4 = scmp.eq.s32.totalorder %s685_s24, 3 }
   0xa   : > { %s933_s28 = scalar_select %p134_p1, %s851_s22, %s136_s26  }
   0xb   : > { %p935_p5 = por %p147_p2, %p146_p0  ;;  %p939_p6 = por %p153_p4, %p152_p3 }
   0xc   : > { %p688_p7 = scmp.ge.s32.totalorder %s855_s23, 1  ;;  %p192_p8 = scmp.lt.s32.totalorder %s855_s23, 5 }
   0xe   : > { %p193_p9 = pnand %p688_p7, %p192_p8 }
   0xf   : > { %s689_s6 = sshll.u32 (!%p193_p9), %s918_s4, 4  ;;  %s217_s11 = sand.u32 (!%p193_p9), 1, %s847_s21  }
  0x10   : > { %196 = sbr.rel (%p193_p9) target bundleno = 523 (0x20b), region = 40  ;;  %p220_p10 = scmp.lt.s32.totalorder (!%p193_p9), %s689_s6, 63 }
  0x11   : > { %s626_s14 = scalar_lea.hbm (!%p193_p9), %s1086_s5, %s918_s4  ;;  %s218_s15 = scalar_lea.vmem (!%p193_p9), [#allocation3], %s217_s11 }
  0x12   : > { %s628_s16 = sshll.u32 (!%p193_p9), %s218_s15, 4  ;;  %s630_s17 = sshll.u32 (!%p193_p9), %s626_s14, 4  ;;  %s629_s16 = int_to_ptr.vmem [resolvable:$true] %s628_s16  ;;  %s631_s17 = int_to_ptr.hbm [resolvable:$true] %s630_s17 }
  0x13   : > { %s618_s18 = scalar_lea.sflag (!%p193_p9), [#allocation4], %s217_s11  ;;  %s807_s19 = sshra.s32 (!%p193_p9), %s631_s17, 4  ;;  %s808_s19 = int_to_ptr.hbm [resolvable:$true] %s807_s19 }
  0x14   : > { %s809_s24 = scalar_lea.hbm (!%p193_p9), %s808_s19, 1  ;;  %s813_s27 = scalar_lea.hbm (!%p193_p9), %s1086_s5, 4 }
  0x15   : > { %s1094_s6 = smov (!%p220_p10, %s689_s6), 63  ;;  %vm288_vm0 = vcmask 130048   ;;  %v971_v22 = vld [vmem:[%s1084_s3] sm:$0xff]  ;;  %v976_v23 = vld [vmem:[%s1084_s3 + $0x10] sm:$0xff]  ;;  %v857_v25 = vmov 0   ;;  %v858_v26 = vmov 1   ;;  %p810_p11 = scmp.ne.s32.totalorder %s808_s19, %s809_s24 }
  0x16   : > { %s690_s7 = sshll.u32 %s1094_s6, 3  ;;  %771 = vset.pattern.permute.xlu0 %v857_v25  ;;  %772 = vset.pattern.permute.xlu1 %v857_v25  ;;  %v987_v30 = vld [vmem:[%s1084_s3 + $0x8] sm:$0xff]  ;;  %v992_v31 = vld [vmem:[%s1084_s3 + $0x18] sm:$0xff]  ;;  %v859_v37 = vmov 2   ;;  %v713_v39 = vld [vmem:[%s1082_s1] sm:$0xff]  ;;  %vm464_vm4 = vcmask 261120   ;;  %p814_p0 = scmp.lt.s32.totalorder %s808_s19, %s1086_s5 }
  0x17   : > { %s949_s10 = scalar_lea.vmem %s1081_s0, %s690_s7  ;;  %260 = vperm.xlu0 %771, %v971_v22   ;;  %270 = vperm.xlu1 %772, %v976_v23   ;;  %v714_v40 = vld [vmem:[%s1082_s1 + $0x8] sm:$0xff]  ;;  %p811_p12 = pnand %p810_p11, %p935_p5 }
  0x18   : > { %v240_v0 = vld [vmem:[%s949_s10 + $0x70] sm:$0xff]  ;;  %v241_v1 = vld [vmem:[%s949_s10 + $0x78] sm:$0xff]  ;;  %v238_v3 = vld [vmem:[%s949_s10 + $0x60] sm:$0xff]  ;;  %773 = vset.pattern.permute.xlu2 %v858_v26  ;;  %p815_p1 = scmp.lt.s32.totalorder %s813_s27, %s809_s24 }
  0x19   : > { %v249_v2 = vpack.c.bf16 %v241_v1, %v240_v0  ;;  %v239_v4 = vld [vmem:[%s949_s10 + $0x68] sm:$0xff]  ;;  %v236_v8 = vld [vmem:[%s949_s10 + $0x50] sm:$0xff]  ;;  %v237_v9 = vld [vmem:[%s949_s10 + $0x58] sm:$0xff]  ;;  %393 = vperm.xlu2 %773, %v976_v23   ;;  %p812_p13 = pneg %p811_p12 }
  0x1a   : > { %v248_v6 = vpack.c.bf16 %v239_v4, %v238_v3  ;;  %v247_v10 = vpack.c.bf16 %v237_v9, %v236_v8  ;;  %v234_v12 = vld [vmem:[%s949_s10 + $0x40] sm:$0xff]  ;;  %v235_v13 = vld [vmem:[%s949_s10 + $0x48] sm:$0xff]  ;;  %v232_v16 = vld [vmem:[%s949_s10 + $0x30] sm:$0xff]  ;;  %p816_p2 = por %p815_p1, %p814_p0 }
  0x1b   : > { %v317_v5 = vsel %vm288_vm0, %v249_v2, 0  ;;  %v246_v14 = vpack.c.bf16 %v235_v13, %v234_v12  ;;  %v233_v17 = vld [vmem:[%s949_s10 + $0x38] sm:$0xff]  ;;  %v230_v20 = vld [vmem:[%s949_s10 + $0x20] sm:$0xff]  ;;  %v231_v21 = vld [vmem:[%s949_s10 + $0x28] sm:$0xff] }
  0x1c   : > { %319 = vmatpush.bf16.xpose.msra.mxu0 %v317_v5  ;;  %717 = vmatpush.bf16.xpose.msra.mxu2 %v317_v5  ;;  %v314_v7 = vsel %vm288_vm0, %v248_v6, 0  ;;  %v311_v11 = vsel %vm288_vm0, %v247_v10, 0  ;;  %v245_v18 = vpack.c.bf16 %v233_v17, %v232_v16  ;;  %v244_v24 = vpack.c.bf16 %v231_v21, %v230_v20  ;;  %v228_v28 = vld [vmem:[%s949_s10 + $0x10] sm:$0xff]  ;;  %v229_v29 = vld [vmem:[%s949_s10 + $0x18] sm:$0xff]  ;;  %v226_v34 = vld [vmem:[%s949_s10] sm:$0xff]  ;;  %p817_p3 = pnand %p816_p2, %p812_p13 }
  0x1d   : > { %v308_v15 = vsel %vm288_vm0, %v246_v14, 0  ;;  %v243_v32 = vpack.c.bf16 %v229_v29, %v228_v28  ;;  %v227_v35 = vld [vmem:[%s949_s10 + $0x8] sm:$0xff]  ;;  %v860_v20 = vmov 3   ;;  %s613_s10 = sld [smem:[#allocation2]] }
  0x1e   : > { %v305_v19 = vsel %vm288_vm0, %v245_v18, 0  ;;  %v302_v27 = vsel %vm288_vm0, %v244_v24, 0  ;;  %v242_v36 = vpack.c.bf16 %v227_v35, %v226_v34 }
  0x1f   : > { %265 = vperm.xlu0 %771, %v987_v30   ;;  %275 = vperm.xlu1 %772, %v992_v31   ;;  %v299_v33 = vsel %vm288_vm0, %v243_v32, 0 }
  0x20   : > { %v296_v38 = vsel %vm288_vm0, %v242_v36, 0 }
  0x21   : > { %397 = vperm.xlu2 %773, %v992_v31  }
  0x24   : > { %320 = vmatpush.bf16.xpose.msra.mxu0 %v314_v7  ;;  %718 = vmatpush.bf16.xpose.msra.mxu2 %v314_v7 }
  0x27   : > { %774 = vset.pattern.permute.xlu0 %v859_v37  ;;  %775 = vset.pattern.permute.xlu1 %v859_v37 }
  0x28   : > { %413 = vperm.xlu0 %774, %v976_v23   ;;  %417 = vperm.xlu1 %775, %v992_v31  }
  0x29   : > { %385 = vperm.xlu2 %773, %v971_v22  }
  0x2c   : > { %321 = vmatpush.bf16.xpose.msra.mxu0 %v311_v11  ;;  %719 = vmatpush.bf16.xpose.msra.mxu2 %v311_v11 }
  0x30   : > { %409 = vperm.xlu0 %774, %v987_v30   ;;  %776 = vset.pattern.permute.xlu1 %v858_v26 }
  0x31   : > { %389 = vperm.xlu1 %776, %v987_v30   ;;  %777 = vset.pattern.permute.xlu2 %v859_v37 }
  0x32   : > { %405 = vperm.xlu2 %777, %v971_v22  }
  0x34   : > { %322 = vmatpush.bf16.xpose.msra.mxu0 %v308_v15  ;;  %720 = vmatpush.bf16.xpose.msra.mxu2 %v308_v15 }
  0x38   : > { %780 = vset.pattern.permute.xlu0 %v860_v20 }
  0x39   : > { %778 = vset.pattern.permute.xlu1 %v860_v20  ;;  %447 = vperm.xlu0 %780, %v976_v23  }
  0x3a   : > { %439 = vperm.xlu1 %778, %v971_v22   ;;  %779 = vset.pattern.permute.xlu2 %v860_v20 }
  0x3b   : > { %443 = vperm.xlu2 %779, %v987_v30  }
  0x3c   : > { %323 = vmatpush.bf16.xpose.msra.mxu0 %v305_v19  ;;  %721 = vmatpush.bf16.xpose.msra.mxu2 %v305_v19 }
  0x42   : > { %451 = vperm.xlu1 %778, %v992_v31  }
  0x44   : > { %324 = vmatpush.bf16.xpose.msra.mxu0 %v302_v27  ;;  %722 = vmatpush.bf16.xpose.msra.mxu2 %v302_v27 }
  0x4c   : > { %325 = vmatpush.bf16.xpose.msra.mxu0 %v299_v33  ;;  %723 = vmatpush.bf16.xpose.msra.mxu2 %v299_v33 }
  0x54   : > { %326 = vmatpush.bf16.xpose.msra.mxu0 %v296_v38  ;;  %724 = vmatpush.bf16.xpose.msra.mxu2 %v296_v38 }
  0x5b   : > { %699 = vmatmul.msk.bf16.vlgmr.msra.gmra.mxu0 %vm288_vm0, %v713_v39  ;;  %700 = vmatmul.msk.bf16.vlgmr.msra.gmra.mxu2 %vm288_vm0, %v714_v40 }
  0x73   : > { %v394_v12 = vpop.permute.xlu2 %393 }
  0x7b   : > { %v398_v18 = vpop.permute.xlu2 %397 }
  0x83   : > { %v386_v27 = vpop.permute.xlu2 %385 }
  0x89   : > { %v261_v41 = vpop.permute.xlu0 %260  ;;  %v271_v43 = vpop.permute.xlu1 %270 }
  0x91   : > { %v266_v46 = vpop.permute.xlu0 %265  ;;  %v276_v54 = vpop.permute.xlu1 %275 }
  0x9a   : > { %v418_v24 = vpop.permute.xlu1 %417  ;;  %v414_v28 = vpop.permute.xlu0 %413 }
  0xa3   : > { %v390_v38 = vpop.permute.xlu1 %389 }
  0xd8   : > { %v328_v42 = vpop.f32.mrf.mxu0 }
  0xd9   : > { %v1015_v45 = vadd.f32 %v328_v42, %v261_v41 }
  0xdb   : > { %v347_v49 = vmul.f32 %v1015_v45, %v1015_v45 }
  0xde   : > { %v333_v44 = vpop.f32.mrf.mxu2 }
  0xdf   : > { %v334_v50 = vadd.f32 %v333_v44, %v271_v43  ;;  %v406_v43 = vpop.permute.xlu2 %405 }
  0xe0   : > { %v330_v47 = vpop.f32.mrf.mxu0 }
  0xe1   : > { %v1017_v48 = vadd.f32 %v330_v47, %v266_v46  ;;  %v349_v56 = vmul.f32 %v334_v50, %v334_v50 }
  0xe3   : > { %v338_v51 = vadd.f32 %v1017_v48, %v1015_v45  ;;  %v348_v52 = vmul.f32 %v1017_v48, %v1017_v48 }
  0xe5   : > { %v351_v53 = vadd.f32 %v348_v52, %v347_v49  ;;  %v339_v58 = vadd.f32 %v338_v51, %v334_v50  ;;  %v410_v51 = vpop.permute.xlu0 %409 }
  0xe6   : > { %v335_v55 = vpop.f32.mrf.mxu2 }
  0xe7   : > { %v336_v57 = vadd.f32 %v335_v55, %v276_v54  ;;  %v352_v61 = vadd.f32 %v351_v53, %v349_v56  ;;  %v861_v55 = vmov 4  }
  0xe8   : > { %781 = vset.pattern.permute.xlu2 %v861_v55  ;;  %782 = vset.pattern.permute.xlu1 %v861_v55 }
  0xe9   : > { %v340_v59 = vadd.f32 %v339_v58, %v336_v57  ;;  %v350_v60 = vmul.f32 %v336_v57, %v336_v57  ;;  %537 = vperm.xlu2 %781, %v971_v22   ;;  %541 = vperm.xlu1 %782, %v987_v30  }
  0xeb   : > { %v341_v62 = vrot.slane %v340_v59, 4  ;;  %v353_v63 = vadd.f32 %v352_v61, %v350_v60 }
  0xed   : > { %v342_v0 = vadd.f32 %v341_v62, %v340_v59  ;;  %v354_v1 = vrot.slane %v353_v63, 4 }
  0xef   : > { %v343_v2 = vrot.slane %v342_v0, 2  ;;  %v355_v3 = vadd.f32 %v354_v1, %v353_v63  ;;  %v715_v1 = vld [vmem:[%s1083_s2] sm:$0xff] }
  0xf1   : > { %v344_v4 = vadd.f32 %v343_v2, %v342_v0  ;;  %v356_v5 = vrot.slane %v355_v3, 2  ;;  %545 = vperm.xlu2 %781, %v976_v23   ;;  %v863_v2 = vmov 6  }
  0xf3   : > { %v345_v6 = vrot.slane %v344_v4, 1  ;;  %v357_v7 = vadd.f32 %v356_v5, %v355_v3  ;;  %v716_v3 = vld [vmem:[%s1083_s2 + $0x8] sm:$0xff]  ;;  %v444_v5 = vpop.permute.xlu2 %443 }
  0xf5   : > { %v346_v8 = vadd.f32 %v345_v6, %v344_v4  ;;  %v358_v9 = vrot.slane %v357_v7, 1  ;;  %v440_v6 = vpop.permute.xlu1 %439 }
  0xf7   : > { %v359_v10 = vadd.f32 %v358_v9, %v357_v7  ;;  %v360_v11 = vmul.f32 0.03125, %v346_v8  ;;  %v448_v7 = vpop.permute.xlu0 %447 }
  0xf9   : > { %v361_v13 = vmul.f32 0.03125, %v359_v10  ;;  %v362_v14 = vmul.f32 %v360_v11, %v360_v11  ;;  %v367_v33 = vsub.f32 %v334_v50, %v360_v11  ;;  %v368_v34 = vsub.f32 %v336_v57, %v360_v11  ;;  %549 = vperm.xlu2 %781, %v992_v31  }
  0xfa   : > { %v365_v35 = vsub.f32 %v1015_v45, %v360_v11  ;;  %v366_v36 = vsub.f32 %v1017_v48, %v360_v11  ;;  %v862_v57 = vmov 5  }
  0xfb   : > { %v363_v15 = vsub.f32 %v361_v13, %v362_v14  ;;  %783 = vset.pattern.permute.xlu0 %v862_v57  ;;  %784 = vset.pattern.permute.xlu1 %v862_v57 }
  0xfc   : > { %557 = vperm.xlu0 %783, %v971_v22   ;;  %561 = vperm.xlu1 %784, %v987_v30  }
  0xfd   : > { %v364_v16 = vmax.f32 %v363_v15, 0.0 }
  0xff   : > { %v369_v17 = vadd.f32 1e-05, %v364_v16 }
 0x101   : > { %789 = vrsqrt.f32 %v369_v17  ;;  %vm376_vm2 = vweird.f32 %v369_v17  ;;  %785 = vset.pattern.permute.xlu2 %v862_v57 }
 0x102   : > { %569 = vperm.xlu2 %785, %v992_v31  }
 0x104   : > { %786 = vset.pattern.permute.xlu0 %v863_v2  ;;  %565 = vperm.xlu1 %784, %v976_v23  }
 0x105   : > { %585 = vperm.xlu0 %786, %v971_v22  }
 0x107   : > { %v790_v19 = vpop.eup %789 }
 0x108   : > { %v371_v21 = vmul.f32 %v790_v19, %v369_v17  ;;  %vm377_vm1 = vweird.f32 %v790_v19 }
 0x109   : > { %vm378_vm3 = vmor %vm376_vm2, %vm377_vm1 }
 0x10a   : > { %v372_v25 = vmul.f32 %v790_v19, %v371_v21  ;;  %788 = vset.pattern.permute.xlu2 %v863_v2 }
 0x10b   : > { %593 = vperm.xlu2 %788, %v976_v23  }
 0x10c   : > { %v373_v26 = vmul.f32 0.5, %v372_v25  ;;  %787 = vset.pattern.permute.xlu1 %v863_v2 }
 0x10d   : > { %589 = vperm.xlu1 %787, %v987_v30   ;;  %v452_v30 = vpop.permute.xlu1 %451 }
 0x10e   : > { %v374_v29 = vsub.f32 1.5, %v373_v26 }
 0x110   : > { %v375_v32 = vmul.f32 %v790_v19, %v374_v29 }
 0x112   : > { %v379_v37 = vsel %vm378_vm3, %v790_v19, %v375_v32 }
 0x113   : > { %v382_v39 = vmul.f32 %v379_v37, %v367_v33  ;;  %v383_v40 = vmul.f32 %v379_v37, %v368_v34  ;;  %v380_v41 = vmul.f32 %v379_v37, %v365_v35  ;;  %v381_v42 = vmul.f32 %v379_v37, %v366_v36 }
 0x115   : > { %v402_v44 = vmul.f32 %v394_v12, %v382_v39  ;;  %v403_v46 = vmul.f32 %v398_v18, %v383_v40  ;;  %v400_v47 = vmul.f32 %v386_v27, %v380_v41  ;;  %v401_v49 = vmul.f32 %v390_v38, %v381_v42  ;;  %597 = vperm.xlu1 %787, %v992_v31  }
 0x117   : > { %v422_v52 = vadd.f32 %v414_v28, %v402_v44  ;;  %v423_v50 = vadd.f32 %v418_v24, %v403_v46  ;;  %v421_v53 = vadd.f32 %v410_v51, %v401_v49  ;;  %v420_v54 = vadd.f32 %v406_v43, %v400_v47 }
 0x119   : > { %v426_v45 = vmul.f32 0.01, %v422_v52  ;;  %v427_v48 = vmul.f32 0.01, %v423_v50  ;;  %v425_v56 = vmul.f32 0.01, %v421_v53 }
 0x11a   : > { %v424_v58 = vmul.f32 0.01, %v420_v54 }
 0x11b   : > { %v430_v59 = vmax.f32 %v422_v52, %v426_v45  ;;  %v431_v60 = vmax.f32 %v423_v50, %v427_v48  ;;  %v429_v63 = vmax.f32 %v421_v53, %v425_v56 }
 0x11c   : > { %v428_v61 = vmax.f32 %v420_v54, %v424_v58 }
 0x11d   : > { %v437_v62 = vpack.c.bf16 %v431_v60, %v430_v59 }
 0x11e   : > { %v436_v0 = vpack.c.bf16 %v429_v63, %v428_v61 }
 0x11f   : > { %477 = vmatpush.bf16.msra.mxu1 %v437_v62 }
 0x123   : > { %478 = vmatpush.bf16.msra.mxu1 %v436_v0 }
 0x126   : > { %709 = vmatmul.msk.bf16.vlgmr.msra.gmra.mxu1 %vm464_vm4, %v715_v1 }
 0x136   : > { %710 = vmatmul.msk.bf16.gmra.mxu1 %vm464_vm4, %v716_v3 }
 0x143   : > { %v538_v37 = vpop.permute.xlu2 %537 }
 0x14b   : > { %v546_v47 = vpop.permute.xlu2 %545 }
 0x153   : > { %v550_v53 = vpop.permute.xlu2 %549 }
 0x15b   : > { %v542_v40 = vpop.permute.xlu1 %541 }
 0x15c   : > { %v570_v62 = vpop.permute.xlu2 %569 }
 0x16e   : > { %v562_v49 = vpop.permute.xlu1 %561  ;;  %v558_v56 = vpop.permute.xlu0 %557 }
 0x176   : > { %v566_v55 = vpop.permute.xlu1 %565 }
 0x1a3   : > { %v480_v22 = vpop.f32.mrf.mxu1 }
 0x1a4   : > { %v481_v10 = vadd.f32 %v480_v22, %v440_v6  ;;  %v590_v6 = vpop.permute.xlu1 %589 }
 0x1a6   : > { %v499_v13 = vmul.f32 %v481_v10, %v481_v10 }
 0x1ab   : > { %v482_v4 = vpop.f32.mrf.mxu1 }
 0x1ac   : > { %v483_v9 = vadd.f32 %v482_v4, %v444_v5 }
 0x1ae   : > { %v500_v12 = vmul.f32 %v483_v9, %v483_v9  ;;  %v490_v14 = vadd.f32 %v483_v9, %v481_v10 }
 0x1b0   : > { %v503_v17 = vadd.f32 %v500_v12, %v499_v13 }
 0x1b3   : > { %v485_v8 = vpop.f32.mrf.mxu1 }
 0x1b4   : > { %v486_v11 = vadd.f32 %v485_v8, %v448_v7 }
 0x1b6   : > { %v501_v15 = vmul.f32 %v486_v11, %v486_v11  ;;  %v491_v18 = vadd.f32 %v490_v14, %v486_v11 }
 0x1b8   : > { %v504_v19 = vadd.f32 %v503_v17, %v501_v15  ;;  %v586_v15 = vpop.permute.xlu0 %585 }
 0x1bb   : > { %v487_v16 = vpop.f32.mrf.mxu1 }
 0x1bc   : > { %v488_v23 = vadd.f32 %v487_v16, %v452_v30 }
 0x1be   : > { %v492_v31 = vadd.f32 %v491_v18, %v488_v23  ;;  %v502_v20 = vmul.f32 %v488_v23, %v488_v23  ;;  %v594_v18 = vpop.permute.xlu2 %593 }
 0x1c0   : > { %v493_v21 = vrot.slane %v492_v31, 4  ;;  %v505_v24 = vadd.f32 %v504_v19, %v502_v20 }
 0x1c2   : > { %v494_v25 = vadd.f32 %v493_v21, %v492_v31  ;;  %v506_v26 = vrot.slane %v505_v24, 4 }
 0x1c4   : > { %v495_v27 = vrot.slane %v494_v25, 2  ;;  %v507_v28 = vadd.f32 %v506_v26, %v505_v24  ;;  %v598_v24 = vpop.permute.xlu1 %597 }
 0x1c6   : > { %v496_v29 = vadd.f32 %v495_v27, %v494_v25  ;;  %v508_v32 = vrot.slane %v507_v28, 2 }
 0x1c8   : > { %v497_v33 = vrot.slane %v496_v29, 1  ;;  %v509_v34 = vadd.f32 %v508_v32, %v507_v28 }
 0x1ca   : > { %v498_v35 = vadd.f32 %v497_v33, %v496_v29  ;;  %v510_v36 = vrot.slane %v509_v34, 1 }
 0x1cc   : > { %v511_v38 = vadd.f32 %v510_v36, %v509_v34  ;;  %v512_v39 = vmul.f32 0.03125, %v498_v35  ;;  %v614_v35 = vstv %s613_s10 }
 0x1ce   : > { %v513_v41 = vmul.f32 0.03125, %v511_v38  ;;  %v514_v42 = vmul.f32 %v512_v39, %v512_v39  ;;  %v517_v57 = vsub.f32 %v481_v10, %v512_v39  ;;  %v519_v58 = vsub.f32 %v486_v11, %v512_v39 }
 0x1cf   : > { %v518_v59 = vsub.f32 %v483_v9, %v512_v39  ;;  %v520_v60 = vsub.f32 %v488_v23, %v512_v39 }
 0x1d0   : > { %v515_v43 = vsub.f32 %v513_v41, %v514_v42 }
 0x1d2   : > { %v516_v44 = vmax.f32 %v515_v43, 0.0 }
 0x1d4   : > { %v521_v46 = vadd.f32 1e-05, %v516_v44 }
 0x1d6   : > { %791 = vrsqrt.f32 %v521_v46  ;;  %vm528_vm6 = vweird.f32 %v521_v46 }
 0x1dc   : > { %v792_v51 = vpop.eup %791 }
 0x1dd   : > { %v523_v52 = vmul.f32 %v792_v51, %v521_v46  ;;  %vm529_vm5 = vweird.f32 %v792_v51 }
 0x1de   : > { %vm530_vm7 = vmor %vm528_vm6, %vm529_vm5 }
 0x1df   : > { %v524_v50 = vmul.f32 %v792_v51, %v523_v52 }
 0x1e1   : > { %v525_v54 = vmul.f32 0.5, %v524_v50 }
 0x1e3   : > { %v526_v45 = vsub.f32 1.5, %v525_v54 }
 0x1e5   : > { %v527_v48 = vmul.f32 %v792_v51, %v526_v45 }
 0x1e7   : > { %v531_v61 = vsel %vm530_vm7, %v792_v51, %v527_v48 }
 0x1e8   : > { %v532_v63 = vmul.f32 %v531_v61, %v517_v57  ;;  %v534_v0 = vmul.f32 %v531_v61, %v519_v58  ;;  %v533_v1 = vmul.f32 %v531_v61, %v518_v59  ;;  %v535_v2 = vmul.f32 %v531_v61, %v520_v60 }
 0x1ea   : > { %v552_v3 = vmul.f32 %v538_v37, %v532_v63  ;;  %v554_v22 = vmul.f32 %v546_v47, %v534_v0  ;;  %v553_v4 = vmul.f32 %v542_v40, %v533_v1  ;;  %v555_v5 = vmul.f32 %v550_v53, %v535_v2 }
 0x1ec   : > { %v573_v7 = vadd.f32 %v562_v49, %v553_v4  ;;  %v574_v8 = vadd.f32 %v566_v55, %v554_v22  ;;  %v572_v12 = vadd.f32 %v558_v56, %v552_v3  ;;  %v575_v13 = vadd.f32 %v570_v62, %v555_v5 }
 0x1ee   : > { %v577_v10 = vmul.f32 0.01, %v573_v7  ;;  %v578_v14 = vmul.f32 0.01, %v574_v8  ;;  %v576_v11 = vmul.f32 0.01, %v572_v12 }
 0x1ef   : > { %v579_v9 = vmul.f32 0.01, %v575_v13 }
 0x1f0   : > { %v581_v30 = vmax.f32 %v573_v7, %v577_v10  ;;  %v582_v16 = vmax.f32 %v574_v8, %v578_v14  ;;  %v580_v17 = vmax.f32 %v572_v12, %v576_v11 }
 0x1f1   : > { %v583_v19 = vmax.f32 %v575_v13, %v579_v9 }
 0x1f2   : > { %v601_v23 = vmul.f32 %v590_v6, %v581_v30  ;;  %v600_v31 = vmul.f32 %v586_v15, %v580_v17  ;;  %v602_v20 = vmul.f32 %v594_v18, %v582_v16 }
 0x1f3   : > { %v603_v25 = vmul.f32 %v598_v24, %v583_v19 }
 0x1f4   : > { %v604_v21 = vadd.f32 %v601_v23, %v600_v31 }
 0x1f6   : > { %v605_v26 = vadd.f32 %v604_v21, %v602_v20 }
 0x1f8   : > { %v606_v27 = vadd.f32 %v605_v26, %v603_v25 }
 0x1fa   : > { %v607_v28 = vrot.slane %v606_v27, 4 }
 0x1fc   : > { %v608_v29 = vadd.f32 %v607_v28, %v606_v27 }
 0x1fe   : > { %v609_v32 = vrot.slane %v608_v29, 2 }
 0x200   : > { %v610_v33 = vadd.f32 %v609_v32, %v608_v29 }
 0x202   : > { %v611_v34 = vrot.slane %v610_v33, 1 }
 0x204   : > { %v612_v36 = vadd.f32 %v611_v34, %v610_v33 }
 0x206   : > { %v615_v37 = vadd.f32 %v614_v35, %v612_v36 }
 0x208   : > { %616 = vst [vmem:[%s218_s15] sm:$0x1] %v615_v37 }
 0x209   : > { %820 = shalt.err (!%p817_p3)
}
 0x20a   : > { %725 = dma.vmem_to_hbm [thread:$0]  (%p935_p5), %s629_s16, 16, %s631_s17, %s618_s18  }
 0x20b PF: > { %p731_p4 = scmp.ge.s32.totalorder %s855_s23, 2  ;;  %s642_s8 = sand.u32 1, %s843_s20  }
 0x20c   : > { %s643_s9 = scalar_lea.sflag [#allocation4], %s642_s8 }
 0x20d   : > { %p728_p7 = pnand %p731_p4, %p939_p6 }
 0x20f   : > { %p729_p8 = pneg %p728_p7 }
 0x211   : > { %838 = dma.done.wait (%p729_p8), %s643_s9, 16  }
 0x212   : > { %840 = vsyncadd (%p729_p8), %s643_s9, 4294967280  ;;  %p16_p9 = scmp.ge.s32.totalorder %s922_s25, 6   ;;  %s1089_s20 = smov %s847_s21 }
 0x213   : > { %s1090_s21 = smov %s851_s22  ;;  %s1091_s22 = smov %s933_s28 }
 0x214   : > { %s1092_s23 = smov %s922_s25  ;;  %18 = sbr.rel (!%p16_p9) target bundleno = 5 (0x5), region = 75 }
 0x219   :  { %648 = vsyncpa [#allocation4], 1 }
 0x21a   :  { %650 = vsyncpa [#allocation4 + $0x1], 1 }

</bundles_post_ra>
